<compile_context>
chip_gen: v7x
topology: tpu7x:2x2x1
jax: 0.10.0
libtpu: 0.0.40
codegen_flags: <defaults>
</compile_context>

<pallas_src>
import functools

import jax
import jax.numpy as jnp
from jax.experimental import pallas as pl
from jax.experimental.pallas import tpu as pltpu

_MAX_BLOCK_BYTES = 2 * 1024 * 1024   # ~2 MiB/block -> ~8 MiB with in+out double buffering
_TARGET_GRID_STEPS = 4               # enough steps to overlap DMA-in / compute / DMA-out


def _leaky_cutoff_sigmoid_kernel(lam_ref, x_ref, o_ref, *, cutoff):
    # lam_ref: (1,) f32 scalar in SMEM (traced -> no recompile per iteration).
    # x_ref / o_ref: (block_rows, width) VMEM tiles.
    lam = lam_ref[0]
    xs = x_ref[...].astype(jnp.float32) * lam
    # (1 + c) * sigmoid(xs) - c  ==  0.5*(1 + c)*tanh(0.5*xs) + 0.5*(1 - c)
    # Single EUP tanh instead of exp + full-precision divide.
    branch_a = 0.5 * (1.0 + cutoff) * jnp.tanh(0.5 * xs) + 0.5 * (1.0 - cutoff)
    branch_b = xs * 0.0001 + 0.01
    y = jnp.clip(jnp.maximum(branch_a, branch_b), 0.0, 1.0)
    o_ref[...] = y.astype(o_ref.dtype)


def _choose_width(n):
    # Largest lane-dense width (multiple of 128) that divides n -> no padding.
    for w in (1024, 512, 256, 128):
        if n % w == 0:
            return w, False
    return 128, True  # rare: needs a tiny (<128 element) tail pad


def _choose_block_rows(rows, width, itemsize):
    if rows <= 8:
        # Tiny input: full-extent block (always legal), single grid step.
        return rows
    max_rows = max(8, _MAX_BLOCK_BYTES // (width * itemsize))
    max_rows = (max_rows // 8) * 8
    br = pl.cdiv(rows, _TARGET_GRID_STEPS)   # aim for >= ~4 pipelined steps
    br = ((br + 7) // 8) * 8                 # sublane dim must stay a multiple of 8
    return min(br, max_rows)


def leaky_cutoff_sigmoid(x, iteration, cutoff: float = 1.0):
    """Pallas TPU implementation of LeakyCutoffSigmoid.forward.

    `iteration` may be a Python int or a traced scalar; lambda_ is fed to the
    kernel through SMEM, so distinct iteration values reuse the same compiled
    kernel.  `cutoff` is a static module constant (as in the PyTorch module).
    """
    cutoff = float(cutoff)
    lam = 1.0 - jnp.float32(0.95) ** (jnp.asarray(iteration, jnp.float32) + 1.0)
    lam = jnp.reshape(lam.astype(jnp.float32), (1,))

    orig_shape = x.shape
    orig_dtype = x.dtype

    flat = x.reshape(-1)
    n = flat.shape[0]
    width, needs_pad = _choose_width(n)
    if needs_pad:
        # TODO(synk): n % 128 != 0 path still pays a pad + slice HBM round-trip;
        # could process the <128-element tail with a tiny separate jnp op instead.
        flat = jnp.pad(flat, (0, (-n) % width))
    rows = flat.shape[0] // width
    x2d = flat.reshape(rows, width)

    itemsize = max(jnp.dtype(orig_dtype).itemsize, 4)
    block_rows = _choose_block_rows(rows, width, itemsize)
    grid = (pl.cdiv(rows, block_rows),)

    n_elems = rows * width
    cost = pl.CostEstimate(
        flops=9 * n_elems,
        transcendentals=n_elems,
        bytes_accessed=2 * n_elems * jnp.dtype(orig_dtype).itemsize,
    )

    kernel = functools.partial(_leaky_cutoff_sigmoid_kernel, cutoff=cutoff)

    y2d = pl.pallas_call(
        kernel,
        out_shape=jax.ShapeDtypeStruct((rows, width), orig_dtype),
        grid=grid,
        in_specs=[
            pl.BlockSpec(memory_space=pltpu.MemorySpace.SMEM),      # lam scalar
            pl.BlockSpec((block_rows, width), lambda i: (i, 0)),    # data tiles
        ],
        out_specs=pl.BlockSpec((block_rows, width), lambda i: (i, 0)),
        compiler_params=pltpu.CompilerParams(
            # Independent row-block axis -> shardable across TensorCores (v7x).
            dimension_semantics=("parallel",),
        ),
        cost_estimate=cost,
    )(lam, x2d)

    y = y2d.reshape(-1)
    if needs_pad:
        y = y[:n]
    return y.reshape(orig_shape)


def _reference(x, iteration, cutoff: float = 1.0):
    """Pure-JAX reference mirroring the PyTorch forward exactly."""
    lambda_ = 1.0 - 0.95 ** (iteration + 1)
    xs = x * lambda_
    y = jnp.maximum((1.0 + cutoff) * jax.nn.sigmoid(xs) - cutoff,
                    xs * 0.0001 + 0.01)
    return jnp.clip(y, 0.0, 1.0)


if __name__ == "__main__":
    key = jax.random.PRNGKey(0)
    iteration = 5

    # Primary NCHW input (2*4*16*16 = 2048 elems -> width 1024, no padding).
    x = jax.random.normal(key, (2, 4, 16, 16), dtype=jnp.float32) * 3.0
    y = jax.block_until_ready(leaky_cutoff_sigmoid(x, iteration, cutoff=1.0))
    y_ref = _reference(x, iteration, cutoff=1.0)
    assert y.shape == x.shape and y.dtype == x.dtype
    assert jnp.allclose(y, y_ref, atol=1e-5, rtol=1e-5), "mismatch vs reference"

    # Same shape, different iteration (exercises the traced-lambda path; same
    # compiled kernel is reused).
    y_b = jax.block_until_ready(leaky_cutoff_sigmoid(x, 12, cutoff=1.0))
    assert jnp.allclose(y_b, _reference(x, 12, cutoff=1.0), atol=1e-5, rtol=1e-5)

    # Medium input exercising the multi-step pipelined grid (64 rows -> 4 steps).
    x_m = jax.random.normal(jax.random.PRNGKey(2), (4, 16, 32, 32), dtype=jnp.float32) * 3.0
    y_m = jax.block_until_ready(leaky_cutoff_sigmoid(x_m, iteration, cutoff=1.0))
    assert jnp.allclose(y_m, _reference(x_m, iteration, cutoff=1.0), atol=1e-5, rtol=1e-5)

    # Ragged shape (945 elems, not a multiple of 128) exercising the tail-pad fallback.
    x2 = jax.random.normal(jax.random.PRNGKey(1), (3, 5, 7, 9), dtype=jnp.float32) * 3.0
    y2 = jax.block_until_ready(leaky_cutoff_sigmoid(x2, iteration, cutoff=1.0))
    y2_ref = _reference(x2, iteration, cutoff=1.0)
    assert y2.shape == x2.shape and y2.dtype == x2.dtype
    assert jnp.allclose(y2, y2_ref, atol=1e-5, rtol=1e-5), "mismatch vs reference (ragged)"

    print("KERNEL_OK")
</pallas_src>

<mosaic_0001>
module attributes {stable_mosaic.version = 11 : i64} {
  func.func @_leaky_cutoff_sigmoid_kernel(%arg0: i32, %arg1: memref<1xf32, #tpu.memory_space<smem>>, %arg2: memref<2x1024xf32, #tpu.memory_space<vmem>>, %arg3: memref<2x1024xf32, #tpu.memory_space<vmem>>) attributes {dimension_semantics = [#tpu.dimension_semantics<parallel>], iteration_bounds = array<i64: 1>, scalar_prefetch = 0 : i64, scratch_operands = 0 : i64, tpu.core_type = #tpu.core_type<tc>, window_params = [{transform_indices = @transform_0, window_bounds = array<i64: 1>}, {transform_indices = @transform_1, window_bounds = array<i64: 2, 1024>}, {transform_indices = @transform_2, window_bounds = array<i64: 2, 1024>}]} {
    %c0 = arith.constant 0 : index
    %0 = memref.load %arg1[%c0] : memref<1xf32, #tpu.memory_space<smem>>
    %c0_0 = arith.constant 0 : index
    %c0_1 = arith.constant 0 : index
    %1 = vector.load %arg2[%c0_0, %c0_1] : memref<2x1024xf32, #tpu.memory_space<vmem>>, vector<2x1024xf32>
    %2 = vector.broadcast %0 : f32 to vector<2x1024xf32>
    %3 = arith.mulf %1, %2 : vector<2x1024xf32>
    %cst = arith.constant 5.000000e-01 : f32
    %4 = vector.broadcast %cst : f32 to vector<2x1024xf32>
    %5 = arith.mulf %4, %3 : vector<2x1024xf32>
    %6 = math.tanh %5 : vector<2x1024xf32>
    %cst_2 = arith.constant 1.000000e+00 : f32
    %7 = vector.broadcast %cst_2 : f32 to vector<2x1024xf32>
    %8 = arith.mulf %7, %6 : vector<2x1024xf32>
    %cst_3 = arith.constant 0.000000e+00 : f32
    %9 = vector.broadcast %cst_3 : f32 to vector<2x1024xf32>
    %10 = arith.addf %8, %9 : vector<2x1024xf32>
    %cst_4 = arith.constant 9.99999974E-5 : f32
    %11 = vector.broadcast %cst_4 : f32 to vector<2x1024xf32>
    %12 = arith.mulf %3, %11 : vector<2x1024xf32>
    %cst_5 = arith.constant 0.00999999977 : f32
    %13 = vector.broadcast %cst_5 : f32 to vector<2x1024xf32>
    %14 = arith.addf %12, %13 : vector<2x1024xf32>
    %15 = arith.maximumf %10, %14 : vector<2x1024xf32>
    %cst_6 = arith.constant 0.000000e+00 : f32
    %cst_7 = arith.constant 1.000000e+00 : f32
    %16 = vector.broadcast %cst_6 : f32 to vector<2x1024xf32>
    %17 = arith.maximumf %16, %15 : vector<2x1024xf32>
    %18 = vector.broadcast %cst_7 : f32 to vector<2x1024xf32>
    %19 = arith.minimumf %18, %17 : vector<2x1024xf32>
    %c0_8 = arith.constant 0 : index
    %c0_9 = arith.constant 0 : index
    %20 = vector.load %arg3[%c0_8, %c0_9] : memref<2x1024xf32, #tpu.memory_space<vmem>>, vector<2x1024xf32>
    tpu.vector_store %arg3[%c0_8, %c0_9], %19 {strides = array<i32>} : memref<2x1024xf32, #tpu.memory_space<vmem>>, vector<2x1024xf32>,
    return
  }
  func.func @transform_0(%arg0: i32) -> i32 {
    %c0_i32 = arith.constant 0 : i32
    %c0_i32_0 = arith.constant 0 : i32
    return %c0_i32 : i32
  }
  func.func @transform_1(%arg0: i32) -> (i32, i32) {
    %c0_i32 = arith.constant 0 : i32
    %c0_i32_0 = arith.constant 0 : i32
    return %arg0, %c0_i32 : i32, i32
  }
  func.func @transform_2(%arg0: i32) -> (i32, i32) {
    %c0_i32 = arith.constant 0 : i32
    %c0_i32_0 = arith.constant 0 : i32
    return %arg0, %c0_i32 : i32, i32
  }
}

</mosaic_0001>

<bundles_post_ra>
// kernel: tpu_custom_call.1
= control target key start
LH: loop header
LB: loop body
LE: loop exit
PB: predicated region body
PF: predicated region fallthrough
CT: control target
= control target key end

     0   :  { %8 = vsyncpa [#allocation4], 0  ;;  %s162_s0 = inlined_call_operand.<no memory space> [shape: f32[1], index: 0, kind: input, shape index: {}]   ;;  %s163_s1 = inlined_call_operand.hbm [shape: f32[2,1024], index: 1, kind: input, shape index: {}]   ;;  %s164_s2 = inlined_call_operand.hbm [shape: f32[2,1024], index: 2, kind: output, shape index: {}]  }
   0x1   :  { %9 = vsyncpa [#allocation5], 0  ;;  %s118_s9 = smov [#allocation3]   ;;  %s70_s13 = scalar_lea.hbm %s163_s1, 256 }
   0x2   :  { %s18_s10 = sshll.u32 %s118_s9, 4  ;;  %p71_p0 = scmp.ne.s32.totalorder %s163_s1, %s70_s13  ;;  %s19_s10 = int_to_ptr.vmem [resolvable:$true] %s18_s10 }
   0x3   :  { %p74_p1 = scmp.lt.u32.totalorder %s70_s13, %s163_s1 }
   0x5   :  { %p76_p2 = pnand %p74_p1, %p71_p0 }
   0x7   :  { %79 = shalt.err (!%p76_p2)
}
   0x8   :  { %s80_s18 = scalar_lea.vmem %s19_s10, 256  ;;  %p85_p4 = scmp.lt.s32.totalorder %s19_s10, %s19_s10 }
   0x9   :  { %p81_p3 = scmp.ne.s32.totalorder %s19_s10, %s80_s18  ;;  %p86_p5 = scmp.lt.s32.totalorder %s80_s18, %s80_s18 }
   0xb   :  { %p87_p6 = por %p86_p5, %p85_p4 }
   0xd   :  { %p88_p7 = pnand %p87_p6, %p81_p3 }
   0xf   :  { %91 = shalt.err (!%p88_p7)
}
  0x10   :  { %21 = dma.hbm_to_vmem [thread:$0]  %s163_s1, 256, %s19_s10, [#allocation4]  }
  0x11   :  { %114 = dma.done.wait [#allocation4], 256  }
  0x12   :  { %115 = vsyncadd [#allocation4], 4294967040  ;;  %v28_v0 = vstv %s162_s0  ;;  %v26_v1 = vld [vmem:[#allocation3] sm:$0xff]  ;;  %v27_v2 = vld [vmem:[#allocation3 + $0x8] sm:$0xff]  ;;  %s119_s1 = smov [#allocation6]  }
  0x13   :  { %v29_v3 = vmul.f32 %v28_v0, %v26_v1  ;;  %v30_v4 = vmul.f32 %v28_v0, %v27_v2  ;;  %s55_s23 = sshll.u32 %s119_s1, 4  ;;  %s56_s23 = int_to_ptr.vmem [resolvable:$true] %s55_s23 }
  0x14   :  { %s92_s0 = scalar_lea.vmem %s56_s23, 256  ;;  %p97_p9 = scmp.lt.s32.totalorder %s56_s23, %s56_s23 }
  0x15   :  { %v31_v5 = vmul.f32 0.5, %v29_v3  ;;  %v32_v6 = vmul.f32 0.5, %v30_v4  ;;  %v37_v7 = vmul.f32 0.0001, %v29_v3  ;;  %v38_v8 = vmul.f32 0.0001, %v30_v4  ;;  %p93_p8 = scmp.ne.s32.totalorder %s56_s23, %s92_s0  ;;  %p98_p10 = scmp.lt.s32.totalorder %s92_s0, %s92_s0 }
  0x17   :  { %66 = vtanh.f32 %v31_v5  ;;  %v39_v9 = vadd.f32 0.01, %v37_v7  ;;  %v40_v10 = vadd.f32 0.01, %v38_v8  ;;  %p99_p11 = por %p98_p10, %p97_p9 }
  0x18   :  { %68 = vtanh.f32 %v32_v6 }
  0x19   :  { %p100_p12 = pnand %p99_p11, %p93_p8 }
  0x21   :  { %v67_v11 = vpop.eup %66 }
  0x22   :  { %v69_v12 = vpop.eup %68  ;;  %v41_v13 = vmax.f32 %v67_v11, %v39_v9 }
  0x23   :  { %v42_v14 = vmax.f32 %v69_v12, %v40_v10 }
  0x24   :  { %v43_v15 = vmax.f32 %v41_v13, 0.0 }
  0x25   :  { %v44_v16 = vmax.f32 %v42_v14, 0.0 }
  0x26   :  { %v45_v17 = vmin.f32 %v43_v15, 1.0 }
  0x27   :  { %v46_v18 = vmin.f32 %v44_v16, 1.0 }
  0x28   :  { %47 = vst [vmem:[#allocation6] sm:$0xff] %v45_v17 }
  0x29   :  { %48 = vst [vmem:[#allocation6 + $0x8] sm:$0xff] %v46_v18 }
  0x2a   :  { %103 = shalt.err (!%p100_p12)
}
  0x2b   :  { %s104_s26 = scalar_lea.hbm %s164_s2, 256 }
  0x2c   :  { %p105_p13 = scmp.ne.s32.totalorder %s164_s2, %s104_s26  ;;  %p108_p0 = scmp.lt.u32.totalorder %s104_s26, %s164_s2 }
  0x2e   :  { %p110_p1 = pnand %p108_p0, %p105_p13 }
  0x30   :  { %113 = shalt.err (!%p110_p1)
}
  0x31   :  { %58 = dma.vmem_to_hbm [thread:$0]  %s56_s23, 256, %s164_s2, [#allocation5]  }
  0x32   :  { %116 = dma.done.wait [#allocation5], 256  }
  0x33   :  { %117 = vsyncadd [#allocation5], 4294967040 }
  0x34   :  { %62 = vsyncpa [#allocation4], 1 }
  0x35   :  { %63 = vsyncpa [#allocation5], 1 }

</bundles_post_ra>
